<compile_context>
chip_gen: v5e
topology: v5e:2x2
jax: 0.10.0
libtpu: 0.0.40
codegen_flags: <defaults>
</compile_context>

<pallas_src>
import functools

import jax
import jax.numpy as jnp
from jax.experimental import pallas as pl
from jax.experimental.pallas import tpu as pltpu


def _round_up(n, m):
    return ((n + m - 1) // m) * m


# ---------------------------------------------------------------------------
# Pallas kernel: fused  out = ReLU(x @ W1 + b1) @ Wh + bh
#   x arrives in its native dtype (f32) and is cast to bf16 in VMEM; both
#   matmuls accumulate in f32 (`preferred_element_type`); biases/output f32.
# ---------------------------------------------------------------------------
def _estimator_kernel(x_ref, w1_ref, b1_ref, wh_ref, bh_ref, out_ref):
    # x: [TM, D_in] f32   w1: [D_in, F] bf16   b1: [1, F] f32
    # wh: [F, H_pad] bf16 bh: [1, H_pad] f32   out: [TM, H_pad] f32
    x = x_ref[...].astype(jnp.bfloat16)
    h = jnp.dot(x, w1_ref[...], preferred_element_type=jnp.float32)
    h = jnp.maximum(h + b1_ref[...], 0.0)                 # BN folded into W1/b1, ReLU
    o = jnp.dot(h.astype(jnp.bfloat16), wh_ref[...],
                preferred_element_type=jnp.float32)
    out_ref[...] = o + bh_ref[...]


def _const_spec(shape):
    """Grid-invariant block (weights / biases): index_map is constant, so keep a
    single VMEM buffer instead of the default double buffer."""
    idx = lambda i: (0, 0)
    try:
        return pl.BlockSpec(shape, idx, pipeline_mode=pl.Buffered(1))
    except TypeError:  # older BlockSpec without pipeline_mode kwarg
        return pl.BlockSpec(shape, idx)


def _choose_tm(batch, tm):
    """Batch-tile heuristic (perf review):
       * tiny B (<128): one 8-aligned tile — this regime is pure overhead anyway.
       * B >= 128: 128-aligned tiles (full 128-row MXU occupancy on v5e).
       * B >= 256: cap so the grid has >= 2 steps (both v7x TensorCores engage).
       * default 512 (~85% of HBM roofline vs ~63% at 256), 1024 for huge B."""
    if tm is None:
        tm = 1024 if batch >= 4096 else 512
    tm = max(128, min(int(tm), 1024))
    if batch < 128:
        return _round_up(max(batch, 1), 8)
    tm = _round_up(tm, 128)
    if batch >= 256:
        tm = min(tm, _round_up((batch + 1) // 2, 128))
    else:
        tm = min(tm, _round_up(batch, 128))
    return tm


def estimator_forward_pallas(x, w1_bf16, b1_f32, wh_bf16, bh_f32, *, tm=None):
    """x: [B, D_in] (f32 or bf16); weights pre-packed (bf16 slabs, f32 bias rows)."""
    B, D_in = x.shape
    F = w1_bf16.shape[1]
    H_pad = wh_bf16.shape[1]

    TM = _choose_tm(B, tm)
    grid = (pl.cdiv(B, TM),)   # ragged last tile → masked partial block, no pad/slice

    # Scoped-VMEM estimate; raise the limit only if we'd exceed v5e's 16 MiB default.
    itemsize = jnp.dtype(x.dtype).itemsize
    vmem_est = (2 * TM * D_in * itemsize            # x tiles (double-buffered)
                + 2 * TM * H_pad * 4                # out tiles (double-buffered)
                + (D_in * F + F * H_pad) * 2        # bf16 weight slabs (single-buffered)
                + (F + H_pad) * 4)                  # bias rows
    vmem_limit = None
    if vmem_est > 12 * 1024 * 1024:
        vmem_limit = int(min(max(2 * vmem_est, 32 << 20), 100 << 20))

    return pl.pallas_call(
        _estimator_kernel,
        out_shape=jax.ShapeDtypeStruct((B, H_pad), jnp.float32),
        grid_spec=pl.GridSpec(
            grid=grid,
            in_specs=[
                pl.BlockSpec((TM, D_in), lambda i: (i, 0)),   # x tile (pipelined)
                _const_spec((D_in, F)),                       # W1  (VMEM-resident)
                _const_spec((1, F)),                          # b1
                _const_spec((F, H_pad)),                      # Wh  (6 heads packed)
                _const_spec((1, H_pad)),                      # bh
            ],
            out_specs=pl.BlockSpec((TM, H_pad), lambda i: (i, 0)),
        ),
        compiler_params=pltpu.CompilerParams(
            dimension_semantics=("parallel",),                # shards grid across v7x TCs
            vmem_limit_bytes=vmem_limit),
    )(x, w1_bf16, b1_f32, wh_bf16, bh_f32)


# ---------------------------------------------------------------------------
# One-time parameter preparation (hoisted out of the per-call forward)
# ---------------------------------------------------------------------------
def pack_estimator_params(params, *, eps=1e-5):
    """Fold eval-mode BatchNorm1d into the first Linear and concatenate the six
    head Linears into one lane-dense (128-padded) weight/bias slab. Run once."""
    scale = params["bn_gamma"] / jnp.sqrt(params["bn_var"] + eps)          # [F]
    w1f = params["w1"] * scale[None, :]                                    # [D_in, F]
    b1f = (params["b1"] - params["bn_mean"]) * scale + params["bn_beta"]   # [F]

    head_ws = [params["w_cls_azi"], params["w_cls_ele"], params["w_cls_inp"],
               params["w_reg_azi"], params["w_reg_ele"], params["w_reg_inp"]]
    head_bs = [params["b_cls_azi"], params["b_cls_ele"], params["b_cls_inp"],
               params["b_reg_azi"], params["b_reg_ele"], params["b_reg_inp"]]
    sizes = tuple(int(w.shape[1]) for w in head_ws)
    total = sum(sizes)
    H_pad = _round_up(total, 128)
    F = w1f.shape[1]

    pad_w = jnp.zeros((F, H_pad - total), jnp.float32)
    pad_b = jnp.zeros((H_pad - total,), jnp.float32)
    wh = jnp.concatenate(head_ws + [pad_w], axis=1)                        # [F, H_pad]
    bh = jnp.concatenate(head_bs + [pad_b])                                # [H_pad]

    return {
        "w1": w1f.astype(jnp.bfloat16),
        "b1": b1f[None, :].astype(jnp.float32),
        "wh": wh.astype(jnp.bfloat16),
        "bh": bh[None, :].astype(jnp.float32),
        "sizes": sizes,
    }


@functools.partial(jax.jit, static_argnames=("sizes",))
def _estimator_forward_impl(x, w1, b1, wh, bh, sizes):
    out = estimator_forward_pallas(x, w1, b1, wh, bh)
    results, off = [], 0
    for n in sizes:                    # static offsets → fused slices inside jit
        results.append(out[:, off:off + n])
        off += n
    return results


def estimator_forward(x, packed):
    """Returns [cls_azi, cls_ele, cls_inp, reg_azi, reg_ele, reg_inp]."""
    return _estimator_forward_impl(x, packed["w1"], packed["b1"],
                                   packed["wh"], packed["bh"], packed["sizes"])


# ---------------------------------------------------------------------------
# Parameter construction + references (test-only glue)
# ---------------------------------------------------------------------------
def make_params(key, img_feature_dim, feat_dim, azi_classes, ele_classes,
                inp_classes):
    ks = jax.random.split(key, 18)
    s = 0.02
    return {
        # project_azi: Linear + BatchNorm1d (only this projection is used in
        # forward — the original code feeds all three branches through it)
        "w1": jax.random.normal(ks[0], (img_feature_dim, feat_dim), jnp.float32) * s,
        "b1": jax.random.normal(ks[1], (feat_dim,), jnp.float32) * s,
        "bn_gamma": 1.0 + 0.1 * jax.random.normal(ks[2], (feat_dim,), jnp.float32),
        "bn_beta": 0.1 * jax.random.normal(ks[3], (feat_dim,), jnp.float32),
        "bn_mean": 0.05 * jax.random.normal(ks[4], (feat_dim,), jnp.float32),
        "bn_var": 1.0 + 0.1 * jax.random.uniform(ks[5], (feat_dim,), jnp.float32),
        # six heads (distinct keys)
        "w_cls_azi": jax.random.normal(ks[6], (feat_dim, azi_classes), jnp.float32) * s,
        "b_cls_azi": jax.random.normal(ks[7], (azi_classes,), jnp.float32) * s,
        "w_cls_ele": jax.random.normal(ks[8], (feat_dim, ele_classes), jnp.float32) * s,
        "b_cls_ele": jax.random.normal(ks[9], (ele_classes,), jnp.float32) * s,
        "w_cls_inp": jax.random.normal(ks[10], (feat_dim, inp_classes), jnp.float32) * s,
        "b_cls_inp": jax.random.normal(ks[11], (inp_classes,), jnp.float32) * s,
        "w_reg_azi": jax.random.normal(ks[12], (feat_dim, azi_classes), jnp.float32) * s,
        "b_reg_azi": jax.random.normal(ks[13], (azi_classes,), jnp.float32) * s,
        "w_reg_ele": jax.random.normal(ks[14], (feat_dim, ele_classes), jnp.float32) * s,
        "b_reg_ele": jax.random.normal(ks[15], (ele_classes,), jnp.float32) * s,
        "w_reg_inp": jax.random.normal(ks[16], (feat_dim, inp_classes), jnp.float32) * s,
        "b_reg_inp": jax.random.normal(ks[17], (inp_classes,), jnp.float32) * s,
    }


def estimator_forward_ref_f32(x, params, *, eps=1e-5):
    """Pure-JAX f32 reference matching the PyTorch module (eval-mode BN)."""
    h = x @ params["w1"] + params["b1"]
    h = (h - params["bn_mean"]) / jnp.sqrt(params["bn_var"] + eps)
    h = h * params["bn_gamma"] + params["bn_beta"]
    h = jnp.maximum(h, 0.0)
    return [
        h @ params["w_cls_azi"] + params["b_cls_azi"],
        h @ params["w_cls_ele"] + params["b_cls_ele"],
        h @ params["w_cls_inp"] + params["b_cls_inp"],
        h @ params["w_reg_azi"] + params["b_reg_azi"],
        h @ params["w_reg_ele"] + params["b_reg_ele"],
        h @ params["w_reg_inp"] + params["b_reg_inp"],
    ]


def estimator_forward_ref_packed(x, packed):
    """Reference with the same bf16 quantization as the kernel (tight check)."""
    xq = x.astype(jnp.bfloat16).astype(jnp.float32)
    w1 = packed["w1"].astype(jnp.float32)
    wh = packed["wh"].astype(jnp.float32)
    h = jnp.maximum(xq @ w1 + packed["b1"], 0.0)
    out = h.astype(jnp.bfloat16).astype(jnp.float32) @ wh + packed["bh"]
    results, off = [], 0
    for n in packed["sizes"]:
        results.append(out[:, off:off + n])
        off += n
    return results


if __name__ == "__main__":
    # Small shapes consistent with the module (module hardcodes feat_dim=512;
    # kept small here): img_feature_dim=256, feat_dim=128, azi=24, ele=12, inp=24.
    D_IN, FEAT = 256, 128
    AZI, ELE, INP = 24, 12, 24

    key = jax.random.PRNGKey(0)
    kx1, kx2, kp = jax.random.split(key, 3)
    params = make_params(kp, D_IN, FEAT, AZI, ELE, INP)
    packed = pack_estimator_params(params)          # one-time prep (hoisted)

    names = ["cls_azi", "cls_ele", "cls_inp", "reg_azi", "reg_ele", "reg_inp"]

    # Two batch regimes: tiny serving batch (B=8, single tile) and a ragged
    # multi-tile batch (B=300 → TM=256, grid=(2,), masked partial last tile).
    for B, kx in ((8, kx1), (300, kx2)):
        x = jax.random.normal(kx, (B, D_IN), jnp.float32)
        outs = jax.block_until_ready(estimator_forward(x, packed))

        refs_q = estimator_forward_ref_packed(x, packed)   # same bf16 quantization
        refs_f = estimator_forward_ref_f32(x, params)      # full-f32 PyTorch-equivalent
        expected = [(B, AZI), (B, ELE), (B, INP), (B, AZI), (B, ELE), (B, INP)]

        for name, o, rq, rf, es in zip(names, outs, refs_q, refs_f, expected):
            assert o.shape == es, (B, name, o.shape, es)
            assert jnp.allclose(o, rq, atol=2e-3, rtol=2e-3), (B, name)
            assert jnp.allclose(o, rf, atol=5e-2, rtol=5e-2), (B, name)

    # TODO(synk): compute_vp_loss / compute_vp_pred (loss & argmax decoding) are
    # not part of forward() and are left out of the kernel.
    print("KERNEL_OK")
</pallas_src>

<mosaic_0001>
module attributes {stable_mosaic.version = 11 : i64} {
  func.func @_estimator_kernel(%arg0: i32, %arg1: memref<8x256xf32, #tpu.memory_space<vmem>>, %arg2: memref<256x128xbf16, #tpu.memory_space<vmem>>, %arg3: memref<1x128xf32, #tpu.memory_space<vmem>>, %arg4: memref<128x128xbf16, #tpu.memory_space<vmem>>, %arg5: memref<1x128xf32, #tpu.memory_space<vmem>>, %arg6: memref<8x128xf32, #tpu.memory_space<vmem>>) attributes {dimension_semantics = [#tpu.dimension_semantics<parallel>], iteration_bounds = array<i64: 1>, scalar_prefetch = 0 : i64, scratch_operands = 0 : i64, tpu.core_type = #tpu.core_type<tc>, window_params = [{transform_indices = @transform_0, window_bounds = array<i64: 8, 256>}, {pipeline_mode = #tpu.pipeline_mode<synchronous>, transform_indices = @transform_1, window_bounds = array<i64: 256, 128>}, {pipeline_mode = #tpu.pipeline_mode<synchronous>, transform_indices = @transform_2, window_bounds = array<i64: 1, 128>}, {pipeline_mode = #tpu.pipeline_mode<synchronous>, transform_indices = @transform_3, window_bounds = array<i64: 128, 128>}, {pipeline_mode = #tpu.pipeline_mode<synchronous>, transform_indices = @transform_4, window_bounds = array<i64: 1, 128>}, {transform_indices = @transform_5, window_bounds = array<i64: 8, 128>}]} {
    %c0 = arith.constant 0 : index
    %c0_0 = arith.constant 0 : index
    %0 = vector.load %arg1[%c0, %c0_0] : memref<8x256xf32, #tpu.memory_space<vmem>>, vector<8x256xf32>
    %1 = arith.truncf %0 : vector<8x256xf32> to vector<8x256xbf16>
    %c0_1 = arith.constant 0 : index
    %c0_2 = arith.constant 0 : index
    %2 = vector.load %arg2[%c0_1, %c0_2] : memref<256x128xbf16, #tpu.memory_space<vmem>>, vector<256x128xbf16>
    %cst = arith.constant dense<0.000000e+00> : vector<8x128xf32>
    %3 = tpu.matmul %1, %2, %cst {dimension_numbers = #tpu.dot_dimension_numbers<[1], [0], [0], [1], [0, 0, 1, 1], [], []>} : vector<8x256xbf16>, vector<256x128xbf16>, vector<8x128xf32> -> vector<8x128xf32>
    %c0_3 = arith.constant 0 : index
    %c0_4 = arith.constant 0 : index
    %4 = vector.load %arg3[%c0_3, %c0_4] : memref<1x128xf32, #tpu.memory_space<vmem>>, vector<1x128xf32>
    %5 = vector.broadcast %4 : vector<1x128xf32> to vector<8x128xf32>
    %6 = arith.addf %3, %5 : vector<8x128xf32>
    %cst_5 = arith.constant 0.000000e+00 : f32
    %7 = vector.broadcast %cst_5 : f32 to vector<8x128xf32>
    %8 = arith.maximumf %6, %7 : vector<8x128xf32>
    %9 = arith.truncf %8 : vector<8x128xf32> to vector<8x128xbf16>
    %c0_6 = arith.constant 0 : index
    %c0_7 = arith.constant 0 : index
    %10 = vector.load %arg4[%c0_6, %c0_7] : memref<128x128xbf16, #tpu.memory_space<vmem>>, vector<128x128xbf16>
    %cst_8 = arith.constant dense<0.000000e+00> : vector<8x128xf32>
    %11 = tpu.matmul %9, %10, %cst_8 {dimension_numbers = #tpu.dot_dimension_numbers<[1], [0], [0], [1], [0, 0, 1, 1], [], []>} : vector<8x128xbf16>, vector<128x128xbf16>, vector<8x128xf32> -> vector<8x128xf32>
    %c0_9 = arith.constant 0 : index
    %c0_10 = arith.constant 0 : index
    %12 = vector.load %arg5[%c0_9, %c0_10] : memref<1x128xf32, #tpu.memory_space<vmem>>, vector<1x128xf32>
    %13 = vector.broadcast %12 : vector<1x128xf32> to vector<8x128xf32>
    %14 = arith.addf %11, %13 : vector<8x128xf32>
    %c0_11 = arith.constant 0 : index
    %c0_12 = arith.constant 0 : index
    %15 = vector.load %arg6[%c0_11, %c0_12] : memref<8x128xf32, #tpu.memory_space<vmem>>, vector<8x128xf32>
    tpu.vector_store %arg6[%c0_11, %c0_12], %14 {strides = array<i32>} : memref<8x128xf32, #tpu.memory_space<vmem>>, vector<8x128xf32>,
    return
  }
  func.func @transform_0(%arg0: i32) -> (i32, i32) {
    %c0_i32 = arith.constant 0 : i32
    %c0_i32_0 = arith.constant 0 : i32
    return %arg0, %c0_i32 : i32, i32
  }
  func.func @transform_1(%arg0: i32) -> (i32, i32) {
    %c0_i32 = arith.constant 0 : i32
    %c0_i32_0 = arith.constant 0 : i32
    %c0_i32_1 = arith.constant 0 : i32
    return %c0_i32, %c0_i32_0 : i32, i32
  }
  func.func @transform_2(%arg0: i32) -> (i32, i32) {
    %c0_i32 = arith.constant 0 : i32
    %c0_i32_0 = arith.constant 0 : i32
    %c0_i32_1 = arith.constant 0 : i32
    return %c0_i32, %c0_i32_0 : i32, i32
  }
  func.func @transform_3(%arg0: i32) -> (i32, i32) {
    %c0_i32 = arith.constant 0 : i32
    %c0_i32_0 = arith.constant 0 : i32
    %c0_i32_1 = arith.constant 0 : i32
    return %c0_i32, %c0_i32_0 : i32, i32
  }
  func.func @transform_4(%arg0: i32) -> (i32, i32) {
    %c0_i32 = arith.constant 0 : i32
    %c0_i32_0 = arith.constant 0 : i32
    %c0_i32_1 = arith.constant 0 : i32
    return %c0_i32, %c0_i32_0 : i32, i32
  }
  func.func @transform_5(%arg0: i32) -> (i32, i32) {
    %c0_i32 = arith.constant 0 : i32
    %c0_i32_0 = arith.constant 0 : i32
    return %arg0, %c0_i32 : i32, i32
  }
}

</mosaic_0001>

<bundles_post_ra>
// kernel: _estimator_forward_impl.1
= control target key start
LH: loop header
LB: loop body
LE: loop exit
PB: predicated region body
PF: predicated region fallthrough
CT: control target
= control target key end

     0   :  { %10 = vsyncpa [#allocation3], 0  ;;  %s573_s0 = inlined_call_operand.hbm [shape: f32[8,256], index: 0, kind: input, shape index: {}]   ;;  %s574_s1 = inlined_call_operand.hbm [shape: bf16[256,128], index: 1, kind: input, shape index: {}]   ;;  %s575_s2 = inlined_call_operand.vmem [shape: f32[1,128], index: 2, kind: input, shape index: {}]   ;;  %s576_s3 = inlined_call_operand.hbm [shape: bf16[128,128], index: 3, kind: input, shape index: {}]   ;;  %s577_s4 = inlined_call_operand.vmem [shape: f32[1,128], index: 4, kind: input, shape index: {}]   ;;  %s578_s5 = inlined_call_operand.vmem [shape: f32[8,128], index: 5, kind: output, shape index: {}]  }
   0x1   :  { %11 = vsyncpa [#allocation5], 0  ;;  %s27_s20 = sshll.u32 %s574_s1, 4  ;;  %s520_s21 = smov [#allocation4]   ;;  %s28_s20 = int_to_ptr.hbm [resolvable:$true] %s27_s20 }
   0x2   :  { %s29_s22 = sshll.u32 %s520_s21, 4  ;;  %s17_s25 = sshll.u32 %s573_s0, 4  ;;  %s30_s22 = int_to_ptr.vmem [resolvable:$true] %s29_s22  ;;  %s18_s25 = int_to_ptr.hbm [resolvable:$true] %s17_s25 }
   0x3   :  { %s521_s26 = smov 64   ;;  %s522_s27 = smov 4  }
   0x4   :  { %35 = dma.hbm_to_vmem [thread:$0]  %s28_s20, 2048, %s30_s22, [#allocation5], %s521_s26, %s521_s26, %s522_s27  }
   0x5   :  { %s523_s28 = smov [#allocation2]   ;;  %s42_s7 = sshll.u32 %s576_s3, 4  ;;  %s43_s7 = int_to_ptr.hbm [resolvable:$true] %s42_s7 }
   0x6   :  { %s19_s29 = sshll.u32 %s523_s28, 4  ;;  %s524_s1 = smov [#allocation6]   ;;  %s20_s29 = int_to_ptr.vmem [resolvable:$true] %s19_s29 }
   0x7   :  { %22 = dma.hbm_to_vmem [thread:$0]  %s18_s25, 256, %s20_s29, [#allocation3]  }
   0x8   :  { %s44_s8 = sshll.u32 %s524_s1, 4  ;;  %s45_s8 = int_to_ptr.vmem [resolvable:$true] %s44_s8 }
   0x9   :  { %50 = dma.hbm_to_vmem [thread:$0]  %s43_s7, 1024, %s45_s8, [#allocation5], %s521_s26, %s521_s26, %s522_s27  }
   0xa   :  { %516 = dma.done.wait [#allocation3], 256  }
   0xb   :  { %517 = vsyncadd [#allocation3], 4294967040 }
   0xc   :  { %518 = dma.done.wait [#allocation5], 3072  }
   0xd   :  { %519 = vsyncadd [#allocation5], 4294964224  ;;  %v420_v0 = vld [vmem:[#allocation4 + $0x38] sm:$0xff]  ;;  %v419_v2 = vld [vmem:[#allocation4 + $0x30] sm:$0xff] }
   0xe   :  { %v428_v1 = vld [vmem:[#allocation4 + $0x78] sm:$0xff]  ;;  %201 = vmatpush.bf16.msra.mxu0 %v420_v0  ;;  %v427_v3 = vld [vmem:[#allocation4 + $0x70] sm:$0xff]  ;;  %v418_v4 = vld [vmem:[#allocation4 + $0x28] sm:$0xff] }
   0xf   :  { %214 = vmatpush.bf16.msra.mxu1 %v428_v1  ;;  %v426_v5 = vld [vmem:[#allocation4 + $0x68] sm:$0xff]  ;;  %v436_v6 = vld [vmem:[#allocation6 + $0x38] sm:$0xff]  ;;  %v435_v7 = vld [vmem:[#allocation6 + $0x30] sm:$0xff] }
  0x10   :  { %297 = vmatpush.bf16.msra.mxu2 %v436_v6  ;;  %v417_v8 = vld [vmem:[#allocation4 + $0x20] sm:$0xff]  ;;  %v434_v10 = vld [vmem:[#allocation6 + $0x28] sm:$0xff]  ;;  %v416_v11 = vld [vmem:[#allocation4 + $0x18] sm:$0xff] }
  0x11   :  { %v425_v9 = vld [vmem:[#allocation4 + $0x60] sm:$0xff]  ;;  %v424_v12 = vld [vmem:[#allocation4 + $0x58] sm:$0xff]  ;;  %v415_v14 = vld [vmem:[#allocation4 + $0x10] sm:$0xff] }
  0x12   :  { %202 = vmatpush.bf16.msra.mxu0 %v419_v2  ;;  %v433_v13 = vld [vmem:[#allocation6 + $0x20] sm:$0xff]  ;;  %v423_v15 = vld [vmem:[#allocation4 + $0x50] sm:$0xff]  ;;  %v432_v16 = vld [vmem:[#allocation6 + $0x18] sm:$0xff] }
  0x13   :  { %215 = vmatpush.bf16.msra.mxu1 %v427_v3  ;;  %v414_v17 = vld [vmem:[#allocation4 + $0x8] sm:$0xff]  ;;  %v431_v19 = vld [vmem:[#allocation6 + $0x10] sm:$0xff]  ;;  %v413_v20 = vld [vmem:[#allocation4] sm:$0xff] }
  0x14   :  { %298 = vmatpush.bf16.msra.mxu2 %v435_v7  ;;  %v422_v18 = vld [vmem:[#allocation4 + $0x48] sm:$0xff]  ;;  %v421_v21 = vld [vmem:[#allocation4 + $0x40] sm:$0xff]  ;;  %v65_v22 = vld [vmem:[#allocation2] sm:$0xff] }
  0x15   :  { %v66_v23 = vld [vmem:[#allocation2 + $0x8] sm:$0xff]  ;;  %v67_v24 = vpack.c.bf16 %v65_v22, %v65_v22  ;;  %v430_v26 = vld [vmem:[#allocation6 + $0x8] sm:$0xff]  ;;  %v429_v27 = vld [vmem:[#allocation6] sm:$0xff] }
  0x16   :  { %203 = vmatpush.bf16.msra.mxu0 %v418_v4  ;;  %v68_v25 = vpack.c.bf16 %v66_v23, %v66_v23  ;;  %v442_v28 = vld [vmem:[%s575_s2] ss:$0 sm:$0xff] }
  0x17   :  { %216 = vmatpush.bf16.msra.mxu1 %v426_v5  ;;  %v443_v37 = vld [vmem:[%s577_s4] ss:$0 sm:$0xff] }
  0x18   :  { %299 = vmatpush.bf16.msra.mxu2 %v434_v10 }
  0x1a   :  { %204 = vmatpush.bf16.msra.mxu0 %v417_v8 }
  0x1b   :  { %217 = vmatpush.bf16.msra.mxu1 %v425_v9 }
  0x1c   :  { %300 = vmatpush.bf16.msra.mxu2 %v433_v13 }
  0x1e   :  { %205 = vmatpush.bf16.msra.mxu0 %v416_v11 }
  0x1f   :  { %218 = vmatpush.bf16.msra.mxu1 %v424_v12 }
  0x20   :  { %301 = vmatpush.bf16.msra.mxu2 %v432_v16 }
  0x22   :  { %206 = vmatpush.bf16.msra.mxu0 %v415_v14 }
  0x23   :  { %219 = vmatpush.bf16.msra.mxu1 %v423_v15 }
  0x24   :  { %302 = vmatpush.bf16.msra.mxu2 %v431_v19 }
  0x26   :  { %207 = vmatpush.bf16.msra.mxu0 %v414_v17 }
  0x27   :  { %220 = vmatpush.bf16.msra.mxu1 %v422_v18 }
  0x28   :  { %303 = vmatpush.bf16.msra.mxu2 %v430_v26 }
  0x2a   :  { %208 = vmatpush.bf16.msra.mxu0 %v413_v20 }
  0x2b   :  { %221 = vmatpush.bf16.msra.mxu1 %v421_v21 }
  0x2c   :  { %304 = vmatpush.bf16.msra.mxu2 %v429_v27 }
  0x2d   :  { %209 = vmatmul.bf16.vlgmr.msra.gmra.mxu0 %v67_v24 }
  0x2e   :  { %222 = vmatmul.bf16.vlgmr.msra.gmra.mxu1 %v68_v25 }
  0xaa   :  { %v210_v29 = vpop.f32.mrf.mxu0 }
  0xab   :  { %v223_v30 = vpop.f32.mrf.mxu1  ;;  %v211_v31 = vadd.f32 %v442_v28, %v210_v29 }
  0xad   :  { %v224_v32 = vadd.f32 %v223_v30, %v211_v31 }
  0xaf   :  { %v227_v33 = vmax.f32 %v224_v32, 0.0 }
  0xb1   :  { %v228_v34 = vpack.c.bf16 %v227_v33, %v227_v33 }
  0xb2   :  { %v212_v35 = vpop.f32.mrf.mxu0 }
  0xb3   :  { %v225_v36 = vpop.f32.mrf.mxu1  ;;  %305 = vmatmul.bf16.vlgmr.msra.gmra.mxu2 %v228_v34 }
 0x136   :  { %v306_v38 = vpop.f32.mrf.mxu2 }
 0x137   :  { %v307_v39 = vadd.f32 %v443_v37, %v306_v38 }
 0x139   :  { %310 = vst [vmem:[%s578_s5] sm:$0xff] %v307_v39 }
 0x13e   :  { %v308_v40 = vpop.f32.mrf.mxu2 }
 0x13f   :  { %315 = vsyncpa [#allocation3], 1 }
 0x140   :  { %316 = vsyncpa [#allocation5], 1 }

</bundles_post_ra>
